<compile_context>
chip_gen: v7x
topology: tpu7x:2x2x1
jax: 0.10.0
libtpu: 0.0.40
codegen_flags: <defaults>
</compile_context>

<pallas_src>
import functools

import jax
import jax.numpy as jnp
from jax.experimental import pallas as pl
from jax.experimental.pallas import tpu as pltpu


def _tempagg_conv3x3_relu_kernel(x_ref, w_ref, b_ref, o_ref, *, Wp, P):
    """One grid step: 3x3 conv + bias + ReLU over one flattened batch block.

    x_ref: (1, Cin, Lext)   bf16.  Lext = Lblk + 2*P.  Bt zero-padded images
                            flattened row-major back-to-back on the lane axis,
                            with a P-lane zero halo on both ends.
    w_ref: (9, Cout, Cin)   bf16, tap-major (k = kh*3 + kw).
    b_ref: (Cout, 1)        f32 bias.
    o_ref: (1, Cout, Lblk)  f32 result on the *padded* grid; only interior
                            positions are valid (wrapper crops them).
    """
    Cout = o_ref.shape[1]
    Lblk = o_ref.shape[2]

    acc = jnp.zeros((Cout, Lblk), jnp.float32)
    # 9 accumulating MXU matmuls directly off lane-shifted ref slices.
    # Static Python loop -> fully unrolled (LLO can interleave loads/pushes).
    for kh in range(3):
        for kw in range(3):
            d = (kh - 1) * Wp + (kw - 1)            # flat tap offset (static)
            xs = x_ref[0, :, pl.ds(P + d, Lblk)]    # (Cin, Lblk) bf16
            acc = acc + jax.lax.dot_general(
                w_ref[kh * 3 + kw], xs,
                dimension_numbers=(((1,), (0,)), ((), ())),
                preferred_element_type=jnp.float32)  # (Cout, Lblk) f32

    acc = jnp.maximum(acc + b_ref[...], 0.0)         # fused bias + ReLU
    o_ref[0] = acc.astype(o_ref.dtype)


def tempagg_conv3x3_relu(x_nchw, w_oihw, b):
    """3x3 conv (stride 1, padding 1, PyTorch Conv2d semantics) + ReLU.

    x_nchw: (B, Cin, H, W);  w_oihw: (Cout, Cin, 3, 3);  b: (Cout,)
    Returns (B, Cout, H, W) float32.
    """
    B, Cin, H, W = x_nchw.shape
    Cout = w_oihw.shape[0]
    Hp, Wp = H + 2, W + 2
    Lp = Hp * Wp
    P = Wp + 1                        # max |tap offset| = (W+2)+1

    # Batch-block so the lane (last) dim of the compute/store tile is >= 128
    # where possible (lane-dense stores) and per-grid-step overhead is
    # amortized for tiny sources.
    Bt = 1 if Lp >= 128 else B
    nblk = B // Bt
    Lblk = Bt * Lp
    Lext = Lblk + 2 * P

    # --- one-time layout glue (plain XLA) --------------------------------
    # NCHW -> spatial zero-pad -> flatten (hp, wp) onto the lane axis with
    # channels on the sublane axis, plus a P-wide zero halo so every tap
    # shift is an in-bounds static lane slice.  Cast to bf16 for the MXU.
    xp = jnp.pad(x_nchw, ((0, 0), (0, 0), (1, 1), (1, 1)))      # (B,Cin,Hp,Wp)
    xf = xp.reshape(B, Cin, Lp)
    xb = (xf.reshape(nblk, Bt, Cin, Lp)
            .transpose(0, 2, 1, 3)
            .reshape(nblk, Cin, Lblk))
    xb = jnp.pad(xb, ((0, 0), (0, 0), (P, P))).astype(jnp.bfloat16)

    # PyTorch weight (Cout, Cin, 3, 3) -> tap-major (9, Cout, Cin) bf16.
    w9 = (jnp.transpose(w_oihw, (2, 3, 0, 1))
            .reshape(9, Cout, Cin).astype(jnp.bfloat16))
    b2 = b.reshape(Cout, 1).astype(jnp.float32)

    kernel = functools.partial(_tempagg_conv3x3_relu_kernel, Wp=Wp, P=P)

    out = pl.pallas_call(
        kernel,
        out_shape=jax.ShapeDtypeStruct((nblk, Cout, Lblk), jnp.float32),
        grid=(nblk,),
        in_specs=[
            pl.BlockSpec((1, Cin, Lext), lambda i: (i, 0, 0)),
            # Weight / bias are grid-invariant; tiny here so default double
            # buffering costs only ~KBs.  For realistic Cout x 9*Cin weights,
            # single-buffer (pipeline_mode=pl.Buffered(1)) or DMA to scratch.
            pl.BlockSpec((9, Cout, Cin), lambda i: (0, 0, 0)),
            pl.BlockSpec((Cout, 1), lambda i: (0, 0)),
        ],
        out_specs=pl.BlockSpec((1, Cout, Lblk), lambda i: (i, 0, 0)),
        compiler_params=pltpu.CompilerParams(
            dimension_semantics=("parallel",),        # v7x: shard blocks on TCs
            vmem_limit_bytes=32 * 1024 * 1024),       # explicit (v5e default 16M)
    )(xb, w9, b2)

    # Un-flatten to the padded NCHW grid and crop the interior.
    y = (out.reshape(nblk, Cout, Bt, Hp, Wp)
            .transpose(0, 2, 1, 3, 4)
            .reshape(B, Cout, Hp, Wp))
    return y[:, :, 1:H + 1, 1:W + 1]


def temporal_aggregator_forward(sources_nchw, tempagg_params):
    """Reproduces TemporalAggregator.forward.

    sources_nchw: list of (B, K*C_i, H_i, W_i) arrays (PyTorch NCHW layout).
    tempagg_params: list of (weight (C_i, K*C_i, 3, 3), bias (C_i,)).
    Returns the list of aggregated sources, each (B, C_i, H_i, W_i).
    """
    sources_new = []
    for x, (w, bb) in zip(sources_nchw, tempagg_params):
        sources_new.append(tempagg_conv3x3_relu(x, w, bb))
    return sources_new


def _ref_tempagg(x_nchw, w_oihw, b):
    # Pure-JAX reference for correctness checking.
    y = jax.lax.conv_general_dilated(
        x_nchw, w_oihw, window_strides=(1, 1), padding=((1, 1), (1, 1)),
        dimension_numbers=("NCHW", "OIHW", "NCHW"),
        precision=jax.lax.Precision.HIGHEST)
    return jnp.maximum(y + b[None, :, None, None], 0.0)


if __name__ == "__main__":
    key = jax.random.PRNGKey(0)

    # Small temporal-SSD-like configuration: K=3 stacked frames, two sources.
    B = 2
    K = 3
    base_channels = [4, 8]     # per-frame channels C_i
    spatial = [16, 8]          # H_i = W_i

    sources, params = [], []
    for c, s in zip(base_channels, spatial):
        key, kx, kw = jax.random.split(key, 3)
        cin = K * c
        sources.append(jax.random.normal(kx, (B, cin, s, s), jnp.float32))
        w = 0.1 * jax.random.normal(kw, (c, cin, 3, 3), jnp.float32)
        bb = 0.01 * jnp.arange(c, dtype=jnp.float32)
        params.append((w, bb))

    outs = temporal_aggregator_forward(sources, params)
    for o in outs:
        jax.block_until_ready(o)

    # Correctness checks.
    for x, (w, bb), o in zip(sources, params, outs):
        # Same-operand-precision reference: the kernel feeds bf16 operands to
        # the MXU with f32 accumulation, so compare against an f32 conv on
        # bf16-rounded operands (tight tolerance).
        xr = x.astype(jnp.bfloat16).astype(jnp.float32)
        wr = w.astype(jnp.bfloat16).astype(jnp.float32)
        ref = _ref_tempagg(xr, wr, bb)
        assert o.shape == ref.shape, (o.shape, ref.shape)
        assert o.dtype == jnp.float32, o.dtype
        assert jnp.allclose(o, ref, atol=2e-3, rtol=2e-3), float(
            jnp.max(jnp.abs(o - ref)))
        # Loose check against the full-f32 PyTorch-equivalent math
        # (bf16 operand rounding only).
        ref32 = _ref_tempagg(x, w, bb)
        assert jnp.allclose(o, ref32, atol=6e-2, rtol=6e-2), float(
            jnp.max(jnp.abs(o - ref32)))

    print("KERNEL_OK")
</pallas_src>

<mosaic_0001>
module attributes {stable_mosaic.version = 11 : i64} {
  func.func @_tempagg_conv3x3_relu_kernel(%arg0: i32, %arg1: memref<1x12x362xbf16, #tpu.memory_space<vmem>>, %arg2: memref<9x4x12xbf16, #tpu.memory_space<vmem>>, %arg3: memref<4x1xf32, #tpu.memory_space<vmem>>, %arg4: memref<1x4x324xf32, #tpu.memory_space<vmem>>) attributes {dimension_semantics = [#tpu.dimension_semantics<parallel>], iteration_bounds = array<i64: 2>, scalar_prefetch = 0 : i64, scratch_operands = 0 : i64, tpu.core_type = #tpu.core_type<tc>, window_params = [{transform_indices = @transform_0, window_bounds = array<i64: 1, 12, 362>}, {pipeline_mode = #tpu.pipeline_mode<synchronous>, transform_indices = @transform_1, window_bounds = array<i64: 9, 4, 12>}, {pipeline_mode = #tpu.pipeline_mode<synchronous>, transform_indices = @transform_2, window_bounds = array<i64: 4, 1>}, {transform_indices = @transform_3, window_bounds = array<i64: 1, 4, 324>}]} {
    %cst = arith.constant 0.000000e+00 : f32
    %0 = vector.broadcast %cst : f32 to vector<4x324xf32>
    %c0 = arith.constant 0 : index
    %c0_0 = arith.constant 0 : index
    %c0_1 = arith.constant 0 : index
    %1 = vector.load %arg1[%c0, %c0_0, %c0_1] : memref<1x12x362xbf16, #tpu.memory_space<vmem>>, vector<1x12x324xbf16>
    %2 = vector.shape_cast %1 : vector<1x12x324xbf16> to vector<12x324xbf16>
    %c0_2 = arith.constant 0 : index
    %c0_3 = arith.constant 0 : index
    %c0_4 = arith.constant 0 : index
    %3 = vector.load %arg2[%c0_2, %c0_3, %c0_4] : memref<9x4x12xbf16, #tpu.memory_space<vmem>>, vector<1x4x12xbf16>
    %4 = vector.shape_cast %3 : vector<1x4x12xbf16> to vector<4x12xbf16>
    %cst_5 = arith.constant dense<0.000000e+00> : vector<4x324xf32>
    %5 = tpu.matmul %4, %2, %cst_5 {dimension_numbers = #tpu.dot_dimension_numbers<[1], [0], [0], [1], [0, 0, 1, 1], [], []>} : vector<4x12xbf16>, vector<12x324xbf16>, vector<4x324xf32> -> vector<4x324xf32>
    %6 = arith.addf %0, %5 : vector<4x324xf32>
    %c0_6 = arith.constant 0 : index
    %c0_7 = arith.constant 0 : index
    %c1 = arith.constant 1 : index
    %7 = vector.load %arg1[%c0_6, %c0_7, %c1] : memref<1x12x362xbf16, #tpu.memory_space<vmem>>, vector<1x12x324xbf16>
    %8 = vector.shape_cast %7 : vector<1x12x324xbf16> to vector<12x324xbf16>
    %c1_8 = arith.constant 1 : index
    %c0_9 = arith.constant 0 : index
    %c0_10 = arith.constant 0 : index
    %9 = vector.load %arg2[%c1_8, %c0_9, %c0_10] : memref<9x4x12xbf16, #tpu.memory_space<vmem>>, vector<1x4x12xbf16>
    %10 = vector.shape_cast %9 : vector<1x4x12xbf16> to vector<4x12xbf16>
    %cst_11 = arith.constant dense<0.000000e+00> : vector<4x324xf32>
    %11 = tpu.matmul %10, %8, %cst_11 {dimension_numbers = #tpu.dot_dimension_numbers<[1], [0], [0], [1], [0, 0, 1, 1], [], []>} : vector<4x12xbf16>, vector<12x324xbf16>, vector<4x324xf32> -> vector<4x324xf32>
    %12 = arith.addf %6, %11 : vector<4x324xf32>
    %c0_12 = arith.constant 0 : index
    %c0_13 = arith.constant 0 : index
    %c2 = arith.constant 2 : index
    %13 = vector.load %arg1[%c0_12, %c0_13, %c2] : memref<1x12x362xbf16, #tpu.memory_space<vmem>>, vector<1x12x324xbf16>
    %14 = vector.shape_cast %13 : vector<1x12x324xbf16> to vector<12x324xbf16>
    %c2_14 = arith.constant 2 : index
    %c0_15 = arith.constant 0 : index
    %c0_16 = arith.constant 0 : index
    %15 = vector.load %arg2[%c2_14, %c0_15, %c0_16] : memref<9x4x12xbf16, #tpu.memory_space<vmem>>, vector<1x4x12xbf16>
    %16 = vector.shape_cast %15 : vector<1x4x12xbf16> to vector<4x12xbf16>
    %cst_17 = arith.constant dense<0.000000e+00> : vector<4x324xf32>
    %17 = tpu.matmul %16, %14, %cst_17 {dimension_numbers = #tpu.dot_dimension_numbers<[1], [0], [0], [1], [0, 0, 1, 1], [], []>} : vector<4x12xbf16>, vector<12x324xbf16>, vector<4x324xf32> -> vector<4x324xf32>
    %18 = arith.addf %12, %17 : vector<4x324xf32>
    %c0_18 = arith.constant 0 : index
    %c0_19 = arith.constant 0 : index
    %c18 = arith.constant 18 : index
    %19 = vector.load %arg1[%c0_18, %c0_19, %c18] : memref<1x12x362xbf16, #tpu.memory_space<vmem>>, vector<1x12x324xbf16>
    %20 = vector.shape_cast %19 : vector<1x12x324xbf16> to vector<12x324xbf16>
    %c3 = arith.constant 3 : index
    %c0_20 = arith.constant 0 : index
    %c0_21 = arith.constant 0 : index
    %21 = vector.load %arg2[%c3, %c0_20, %c0_21] : memref<9x4x12xbf16, #tpu.memory_space<vmem>>, vector<1x4x12xbf16>
    %22 = vector.shape_cast %21 : vector<1x4x12xbf16> to vector<4x12xbf16>
    %cst_22 = arith.constant dense<0.000000e+00> : vector<4x324xf32>
    %23 = tpu.matmul %22, %20, %cst_22 {dimension_numbers = #tpu.dot_dimension_numbers<[1], [0], [0], [1], [0, 0, 1, 1], [], []>} : vector<4x12xbf16>, vector<12x324xbf16>, vector<4x324xf32> -> vector<4x324xf32>
    %24 = arith.addf %18, %23 : vector<4x324xf32>
    %c0_23 = arith.constant 0 : index
    %c0_24 = arith.constant 0 : index
    %c19 = arith.constant 19 : index
    %25 = vector.load %arg1[%c0_23, %c0_24, %c19] : memref<1x12x362xbf16, #tpu.memory_space<vmem>>, vector<1x12x324xbf16>
    %26 = vector.shape_cast %25 : vector<1x12x324xbf16> to vector<12x324xbf16>
    %c4 = arith.constant 4 : index
    %c0_25 = arith.constant 0 : index
    %c0_26 = arith.constant 0 : index
    %27 = vector.load %arg2[%c4, %c0_25, %c0_26] : memref<9x4x12xbf16, #tpu.memory_space<vmem>>, vector<1x4x12xbf16>
    %28 = vector.shape_cast %27 : vector<1x4x12xbf16> to vector<4x12xbf16>
    %cst_27 = arith.constant dense<0.000000e+00> : vector<4x324xf32>
    %29 = tpu.matmul %28, %26, %cst_27 {dimension_numbers = #tpu.dot_dimension_numbers<[1], [0], [0], [1], [0, 0, 1, 1], [], []>} : vector<4x12xbf16>, vector<12x324xbf16>, vector<4x324xf32> -> vector<4x324xf32>
    %30 = arith.addf %24, %29 : vector<4x324xf32>
    %c0_28 = arith.constant 0 : index
    %c0_29 = arith.constant 0 : index
    %c20 = arith.constant 20 : index
    %31 = vector.load %arg1[%c0_28, %c0_29, %c20] : memref<1x12x362xbf16, #tpu.memory_space<vmem>>, vector<1x12x324xbf16>
    %32 = vector.shape_cast %31 : vector<1x12x324xbf16> to vector<12x324xbf16>
    %c5 = arith.constant 5 : index
    %c0_30 = arith.constant 0 : index
    %c0_31 = arith.constant 0 : index
    %33 = vector.load %arg2[%c5, %c0_30, %c0_31] : memref<9x4x12xbf16, #tpu.memory_space<vmem>>, vector<1x4x12xbf16>
    %34 = vector.shape_cast %33 : vector<1x4x12xbf16> to vector<4x12xbf16>
    %cst_32 = arith.constant dense<0.000000e+00> : vector<4x324xf32>
    %35 = tpu.matmul %34, %32, %cst_32 {dimension_numbers = #tpu.dot_dimension_numbers<[1], [0], [0], [1], [0, 0, 1, 1], [], []>} : vector<4x12xbf16>, vector<12x324xbf16>, vector<4x324xf32> -> vector<4x324xf32>
    %36 = arith.addf %30, %35 : vector<4x324xf32>
    %c0_33 = arith.constant 0 : index
    %c0_34 = arith.constant 0 : index
    %c36 = arith.constant 36 : index
    %37 = vector.load %arg1[%c0_33, %c0_34, %c36] : memref<1x12x362xbf16, #tpu.memory_space<vmem>>, vector<1x12x324xbf16>
    %38 = vector.shape_cast %37 : vector<1x12x324xbf16> to vector<12x324xbf16>
    %c6 = arith.constant 6 : index
    %c0_35 = arith.constant 0 : index
    %c0_36 = arith.constant 0 : index
    %39 = vector.load %arg2[%c6, %c0_35, %c0_36] : memref<9x4x12xbf16, #tpu.memory_space<vmem>>, vector<1x4x12xbf16>
    %40 = vector.shape_cast %39 : vector<1x4x12xbf16> to vector<4x12xbf16>
    %cst_37 = arith.constant dense<0.000000e+00> : vector<4x324xf32>
    %41 = tpu.matmul %40, %38, %cst_37 {dimension_numbers = #tpu.dot_dimension_numbers<[1], [0], [0], [1], [0, 0, 1, 1], [], []>} : vector<4x12xbf16>, vector<12x324xbf16>, vector<4x324xf32> -> vector<4x324xf32>
    %42 = arith.addf %36, %41 : vector<4x324xf32>
    %c0_38 = arith.constant 0 : index
    %c0_39 = arith.constant 0 : index
    %c37 = arith.constant 37 : index
    %43 = vector.load %arg1[%c0_38, %c0_39, %c37] : memref<1x12x362xbf16, #tpu.memory_space<vmem>>, vector<1x12x324xbf16>
    %44 = vector.shape_cast %43 : vector<1x12x324xbf16> to vector<12x324xbf16>
    %c7 = arith.constant 7 : index
    %c0_40 = arith.constant 0 : index
    %c0_41 = arith.constant 0 : index
    %45 = vector.load %arg2[%c7, %c0_40, %c0_41] : memref<9x4x12xbf16, #tpu.memory_space<vmem>>, vector<1x4x12xbf16>
    %46 = vector.shape_cast %45 : vector<1x4x12xbf16> to vector<4x12xbf16>
    %cst_42 = arith.constant dense<0.000000e+00> : vector<4x324xf32>
    %47 = tpu.matmul %46, %44, %cst_42 {dimension_numbers = #tpu.dot_dimension_numbers<[1], [0], [0], [1], [0, 0, 1, 1], [], []>} : vector<4x12xbf16>, vector<12x324xbf16>, vector<4x324xf32> -> vector<4x324xf32>
    %48 = arith.addf %42, %47 : vector<4x324xf32>
    %c0_43 = arith.constant 0 : index
    %c0_44 = arith.constant 0 : index
    %c38 = arith.constant 38 : index
    %49 = vector.load %arg1[%c0_43, %c0_44, %c38] : memref<1x12x362xbf16, #tpu.memory_space<vmem>>, vector<1x12x324xbf16>
    %50 = vector.shape_cast %49 : vector<1x12x324xbf16> to vector<12x324xbf16>
    %c8 = arith.constant 8 : index
    %c0_45 = arith.constant 0 : index
    %c0_46 = arith.constant 0 : index
    %51 = vector.load %arg2[%c8, %c0_45, %c0_46] : memref<9x4x12xbf16, #tpu.memory_space<vmem>>, vector<1x4x12xbf16>
    %52 = vector.shape_cast %51 : vector<1x4x12xbf16> to vector<4x12xbf16>
    %cst_47 = arith.constant dense<0.000000e+00> : vector<4x324xf32>
    %53 = tpu.matmul %52, %50, %cst_47 {dimension_numbers = #tpu.dot_dimension_numbers<[1], [0], [0], [1], [0, 0, 1, 1], [], []>} : vector<4x12xbf16>, vector<12x324xbf16>, vector<4x324xf32> -> vector<4x324xf32>
    %54 = arith.addf %48, %53 : vector<4x324xf32>
    %c0_48 = arith.constant 0 : index
    %c0_49 = arith.constant 0 : index
    %55 = vector.load %arg3[%c0_48, %c0_49] : memref<4x1xf32, #tpu.memory_space<vmem>>, vector<4x1xf32>
    %56 = vector.broadcast %55 : vector<4x1xf32> to vector<4x324xf32>
    %57 = arith.addf %54, %56 : vector<4x324xf32>
    %cst_50 = arith.constant 0.000000e+00 : f32
    %58 = vector.broadcast %cst_50 : f32 to vector<4x324xf32>
    %59 = arith.maximumf %57, %58 : vector<4x324xf32>
    %c0_51 = arith.constant 0 : index
    %c0_52 = arith.constant 0 : index
    %c0_53 = arith.constant 0 : index
    %60 = vector.load %arg4[%c0_51, %c0_52, %c0_53] : memref<1x4x324xf32, #tpu.memory_space<vmem>>, vector<1x4x324xf32>
    %61 = vector.shape_cast %60 : vector<1x4x324xf32> to vector<4x324xf32>
    %62 = vector.shape_cast %59 : vector<4x324xf32> to vector<1x4x324xf32>
    tpu.vector_store %arg4[%c0_51, %c0_52, %c0_53], %62 {strides = array<i32>} : memref<1x4x324xf32, #tpu.memory_space<vmem>>, vector<1x4x324xf32>,
    return
  }
  func.func @transform_0(%arg0: i32) -> (i32, i32, i32) {
    %c0_i32 = arith.constant 0 : i32
    %c0_i32_0 = arith.constant 0 : i32
    %c0_i32_1 = arith.constant 0 : i32
    return %arg0, %c0_i32, %c0_i32_0 : i32, i32, i32
  }
  func.func @transform_1(%arg0: i32) -> (i32, i32, i32) {
    %c0_i32 = arith.constant 0 : i32
    %c0_i32_0 = arith.constant 0 : i32
    %c0_i32_1 = arith.constant 0 : i32
    %c0_i32_2 = arith.constant 0 : i32
    return %c0_i32, %c0_i32_0, %c0_i32_1 : i32, i32, i32
  }
  func.func @transform_2(%arg0: i32) -> (i32, i32) {
    %c0_i32 = arith.constant 0 : i32
    %c0_i32_0 = arith.constant 0 : i32
    %c0_i32_1 = arith.constant 0 : i32
    return %c0_i32, %c0_i32_0 : i32, i32
  }
  func.func @transform_3(%arg0: i32) -> (i32, i32, i32) {
    %c0_i32 = arith.constant 0 : i32
    %c0_i32_0 = arith.constant 0 : i32
    %c0_i32_1 = arith.constant 0 : i32
    return %arg0, %c0_i32, %c0_i32_0 : i32, i32, i32
  }
}

</mosaic_0001>

<bundles_post_ra>
// kernel: tpu_custom_call.1
= control target key start
LH: loop header
LB: loop body
LE: loop exit
PB: predicated region body
PF: predicated region fallthrough
CT: control target
= control target key end

     0   :  { %8 = vsyncpa [#allocation3], 0  ;;  %s1719_s0 = inlined_call_operand.vmem [shape: bf16[2,12,362], index: 0, kind: input, shape index: {}]   ;;  %s1720_s1 = inlined_call_operand.vmem [shape: bf16[9,4,12], index: 1, kind: input, shape index: {}]   ;;  %s1721_s2 = inlined_call_operand.vmem [shape: f32[4,1], index: 2, kind: input, shape index: {}]   ;;  %s1722_s3 = inlined_call_operand.hbm [shape: f32[2,4,324], index: 3, kind: output, shape index: {}]  }
   0x1   :  { %10 = vsyncpa [#allocation3 + $0x1], 0  ;;  %s1501_s12 = smov 0   ;;  %s1503_s13 = smov 0  }
   0x2   :  { %s1505_s14 = smov 0   ;;  %s1507_s15 = smov 0  }
   0x3 LB: > { %s1522_s16 = sadd.s32 4294967295, %s1467_s15   ;;  %s1229_s17 = sadd.s32 4294967294, %s1467_s15   ;;  %s1467_s15 = sphi %s1507_s15, %s1728_s15   ;;  %s1463_s14 = sphi %s1505_s14, %s1727_s14   ;;  %s1459_s13 = sphi %s1503_s13, %s1726_s13   ;;  %s1455_s12 = sphi %s1501_s12, %s1725_s12  }
   0x4   : > { %s1526_s18 = sadd.s32 1, %s1467_s15   ;;  %s91_s19 = sadd.s32 1, %s1463_s14 }
   0x5   : > { %s88_s20 = ssub.s32 %s1467_s15, %s1526_s18  ;;  %p101_p0 = scmp.ne.s32.totalorder %s1463_s14, %s1459_s13 }
   0x6   : > { %p89_p1 = scmp.eq.s32.totalorder %s88_s20, 0  ;;  %p102_p2 = scmp.eq.s32.totalorder %s1522_s16, 1 }
   0x7   : > { %p107_p3 = scmp.ne.s32.totalorder %s1459_s13, %s1455_s12  ;;  %p108_p4 = scmp.eq.s32.totalorder %s1229_s17, 1 }
   0x8   : > { %s1537_s21 = scalar_select %p89_p1, %s1463_s14, %s91_s19  }
   0x9   : > { %p1539_p5 = por %p102_p2, %p101_p0  ;;  %p1543_p6 = por %p108_p4, %p107_p3 }
   0xa   : > { %p1232_p7 = scmp.ge.s32.totalorder %s1467_s15, 1  ;;  %p140_p8 = scmp.lt.s32.totalorder %s1467_s15, 3 }
   0xc   : > { %p141_p9 = pnand %p1232_p7, %p140_p8 }
   0xd   : > { %p164_p10 = scmp.lt.s32.totalorder (!%p141_p9), %s1522_s16, 1  ;;  %v1469_v0 = vmov (!%p141_p9), 0.0   ;;  %vm1470_vm0 = vmmov (!%p141_p9), 0   ;;  %v1471_v1 = vmov (!%p141_p9), 0   ;;  %s1472_s29 = smov (!%p141_p9), 127   ;;  %vm203_vm1 = vcmask (!%p141_p9), 1045504  }
   0xe   : > { %144 = sbr.rel (%p141_p9) target bundleno = 451 (0x1c3), region = 32  ;;  %1293 = vmatprep.subr.bf16.mxu1 (!%p141_p9), %v1469_v0  ;;  %1295 = vmatprep.mubr.msk.bf16.mxu1 (!%p141_p9), %vm1470_vm0, %v1469_v0  ;;  %s1473_s30 = smov (!%p141_p9), 126   ;;  %v1136_v5 = vld [vmem:[%s1721_s2] sm:$0xf] (!%p141_p9)  ;;  %vm199_vm2 = vcmask (!%p141_p9), 97280   ;;  %vm196_vm3 = vcmask (!%p141_p9), 1039360  }
   0xf   : > { %245 = vmatprep.mubr.bf16.mxu0 (!%p141_p9), %v1471_v1  ;;  %1400 = vset.pattern.permute.xlu0 (!%p141_p9), %v1471_v1  ;;  %s1474_s4 = smov (!%p141_p9), 110   ;;  %s1475_s5 = smov (!%p141_p9), 109   ;;  %v1234_v9 = vld [vmem:[%s1720_s1 + $0x2] sm:$0x3] (!%p141_p9)  ;;  %vm395_vm4 = vcmask (!%p141_p9), 1031168   ;;  %vm502_vm5 = vcmask (!%p141_p9), 900096  }
  0x10   : > { %s1476_s6 = smov (!%p141_p9), 108   ;;  %s1477_s7 = smov (!%p141_p9), 92   ;;  %v174_v19 = vld [vmem:[%s1720_s1] sm:$0x3] (!%p141_p9)  ;;  %v1244_v28 = vld [vmem:[%s1720_s1 + $0x4] sm:$0x3] (!%p141_p9) }
  0x11   : > { %s1478_s8 = smov (!%p141_p9), 91   ;;  %s1479_s9 = smov (!%p141_p9), 90   ;;  %vm609_vm6 = vcmask (!%p141_p9), 891904   ;;  %v1248_v36 = vld [vmem:[%s1720_s1 + $0x6] sm:$0x3] (!%p141_p9)  ;;  %vm716_vm7 = vcmask (!%p141_p9), 883712  }
  0x12   : > { %v1252_v44 = vld [vmem:[%s1720_s1 + $0x8] sm:$0x3] (!%p141_p9)  ;;  %vm823_vm8 = vcmask (!%p141_p9), 752640   ;;  %v1256_v52 = vld [vmem:[%s1720_s1 + $0xa] sm:$0x3] (!%p141_p9)  ;;  %vm930_vm9 = vcmask (!%p141_p9), 744448  }
  0x13   : > { %v1260_v60 = vld [vmem:[%s1720_s1 + $0xc] sm:$0x3] (!%p141_p9)  ;;  %vm1037_vm10 = vcmask (!%p141_p9), 736256   ;;  %s161_s17 = sand.u32 (!%p141_p9), 1, %s1459_s13   ;;  %vm1153_vm11 = vcmask (!%p141_p9), 551936  }
  0x14   : > { %s1347_s19 = smul.u32 (!%p141_p9), 12, %s161_s17 }
  0x15   : > { %s165_s24 = scalar_select %p164_p10, %s1522_s16, 1 }
  0x16   : > { %s163_s20 = scalar_lea.vmem [#allocation2], %s1347_s19 }
  0x17   : > { %s1348_s25 = smul.u32 24, %s165_s24 }
  0x18   : > { %s1349_s24 = smul.u32 192, %s1522_s16  ;;  %s1480_s16 = smov [#allocation2]  }
  0x19   : > { %s168_s28 = scalar_lea.vmem %s1719_s0, %s1348_s25  ;;  %s1170_s25 = sshll.u32 %s163_s20, 4  ;;  %s1677_s25 = int_to_ptr.vmem [resolvable:$true] %s1170_s25 }
  0x1a   : > { %v1401_v2 = vld [vmem:[%s168_s28 + $0x8] ss:$12 sps:$4 sm:$0x3f]   ;;  %v1402_v3 = vld [vmem:[%s168_s28] ss:$12 sps:$4 sm:$0x3f]  }
  0x1b   : > { %194 = vrot.lane.b32.xlu1 %v1401_v2, %s1472_s29  ;;  %190 = vrot.lane.b32.xlu0 %v1402_v3, %s1472_s29  ;;  %v1404_v4 = vld [vmem:[%s168_s28 + $0x4] ss:$12 sps:$4 sm:$0x3f]   ;;  %v304_v10 = vsel %vm203_vm1, %v1401_v2, 0  ;;  %v298_v17 = vsel %vm203_vm1, %v1402_v3, 0  ;;  %s1675_s28 = scalar_lea.hbm %s1722_s3, %s1349_s24 }
  0x1f   : > { %389 = vrot.lane.b32.xlu1 %v1402_v3, %s1473_s30  ;;  %192 = vrot.lane.b32.xlu0 %v1404_v4, %s1472_s29  ;;  %s1156_s29 = scalar_lea.sflag [#allocation3], %s161_s17 }
  0x23   : > { %393 = vrot.lane.b32.xlu1 %v1401_v2, %s1473_s30  ;;  %391 = vrot.lane.b32.xlu0 %v1404_v4, %s1473_s30  ;;  %s1405_s30 = scalar_lea.vmem %s1677_s25, 192 }
  0x24   : > { %p1406_p11 = scmp.ne.s32.totalorder %s1677_s25, %s1405_s30 }
  0x26   : > { %p1407_p12 = pnand %p1406_p11, %p1539_p5 }
  0x27   : > { %498 = vrot.lane.b32.xlu1 %v1404_v4, %s1474_s4  ;;  %496 = vrot.lane.b32.xlu0 %v1402_v3, %s1474_s4 }
  0x28   : > { %p1408_p13 = pneg %p1407_p12 }
  0x2b   : > { %603 = vrot.lane.b32.xlu1 %v1402_v3, %s1475_s5  ;;  %500 = vrot.lane.b32.xlu0 %v1401_v2, %s1474_s4  ;;  %s1409_s4 = sshll.u32 %s1480_s16, 4  ;;  %s1410_s4 = int_to_ptr.vmem [resolvable:$false] %s1409_s4 }
  0x2c   : > { %p1412_p0 = scmp.lt.s32.totalorder %s1677_s25, %s1410_s4 }
  0x2f   : > { %607 = vrot.lane.b32.xlu1 %v1401_v2, %s1475_s5  ;;  %605 = vrot.lane.b32.xlu0 %v1404_v4, %s1475_s5  ;;  %s1411_s5 = scalar_lea.vmem %s1410_s4, 384 }
  0x30   : > { %p1413_p1 = scmp.lt.s32.totalorder %s1411_s5, %s1405_s30 }
  0x32   : > { %p1414_p2 = por %p1413_p1, %p1412_p0 }
  0x33   : > { %712 = vrot.lane.b32.xlu1 %v1404_v4, %s1476_s6  ;;  %710 = vrot.lane.b32.xlu0 %v1402_v3, %s1476_s6 }
  0x34   : > { %p1415_p3 = pnand %p1414_p2, %p1408_p13 }
  0x37   : > { %817 = vrot.lane.b32.xlu1 %v1402_v3, %s1477_s7  ;;  %714 = vrot.lane.b32.xlu0 %v1401_v2, %s1476_s6 }
  0x3b   : > { %821 = vrot.lane.b32.xlu1 %v1401_v2, %s1477_s7  ;;  %819 = vrot.lane.b32.xlu0 %v1404_v4, %s1477_s7 }
  0x3f   : > { %926 = vrot.lane.b32.xlu1 %v1404_v4, %s1478_s8  ;;  %924 = vrot.lane.b32.xlu0 %v1402_v3, %s1478_s8 }
  0x43   : > { %1031 = vrot.lane.b32.xlu1 %v1402_v3, %s1479_s9  ;;  %928 = vrot.lane.b32.xlu0 %v1401_v2, %s1478_s8 }
  0x47   : > { %1035 = vrot.lane.b32.xlu1 %v1401_v2, %s1479_s9  ;;  %1033 = vrot.lane.b32.xlu0 %v1404_v4, %s1479_s9 }
  0x4b   : > { %1139 = vperm.xlu0 %1400, %v1136_v5   ;;  %v1264_v5 = vld [vmem:[%s1720_s1 + $0xe] sm:$0x3] }
  0x8d   : > { %v195_v6 = vpop.permute.xlu1 %194  ;;  %v191_v7 = vpop.permute.xlu0 %190 }
  0x8e   : > { %v211_v8 = vsel %vm203_vm1, %v195_v6, 0 }
  0x8f   : > { %1294 = vmatpush3.bf16.msra.mxu1 %v211_v8 }
  0x90   : > { %1299 = vmatprep.subr.bf16.mxu1 %v1469_v0 }
  0x91   : > { %v390_v11 = vpop.permute.xlu1 %389  ;;  %v193_v12 = vpop.permute.xlu0 %192 }
  0x92   : > { %1296 = vmatmul.mubr.msk.bf16.vlgmr.msra.gmra.mrb[0].mxu1 %vm199_vm2, %v1234_v9  ;;  %v198_v13 = vsel %vm196_vm3, %v193_v12, %v195_v6  ;;  %v197_v14 = vsel %vm196_vm3, %v191_v7, %v193_v12 }
  0x93   : > { %1300 = vmatpush3.bf16.msra.mxu1 %v304_v10  ;;  %1301 = vmatprep.mubr.msk.bf16.mxu1 %vm1470_vm0, %v1469_v0  ;;  %v205_v15 = vsel %vm203_vm1, %v197_v14, 0  ;;  %v1268_v10 = vld [vmem:[%s1720_s1 + $0x10] sm:$0x3] }
  0x94   : > { %1238 = vmatprep.subr.msk.bf16.mxu0 %vm203_vm1, %v198_v13  ;;  %1305 = vmatprep.subr.bf16.mxu1 %v1469_v0 }
  0x95   : > { %214 = vmatpush1.bf16.msra.mxu0 %v205_v15  ;;  %v394_v16 = vpop.permute.xlu1 %393  ;;  %v392_v18 = vpop.permute.xlu0 %391 }
  0x96   : > { %1241 = vmatprep.subr.msk.bf16.mxu0 %vm203_vm1, %v1404_v4  ;;  %v397_v20 = vsel %vm395_vm4, %v392_v18, %v394_v16  ;;  %v408_v21 = vsel %vm203_vm1, %v394_v16, 0  ;;  %v396_v24 = vsel %vm395_vm4, %v390_v11, %v392_v18 }
  0x97   : > { %v402_v25 = vsel %vm203_vm1, %v396_v24, 0 }
  0x98   : > { %1239 = vmatmul.mubr.msk.bf16.vlgmr.msra.gmra.mrb[0].mxu0 %vm199_vm2, %v1234_v9 }
  0x99   : > { %307 = vmatpush1.bf16.msra.mxu0 %v298_v17  ;;  %338 = vmatprep.mubr.bf16.mxu0 %v1471_v1  ;;  %v499_v22 = vpop.permute.xlu1 %498  ;;  %v497_v23 = vpop.permute.xlu0 %496 }
  0x9a   : > { %1302 = vmatmul.mubr.msk.bf16.vlgmr.msra.gmra.mrb[4].mxu1 %vm199_vm2, %v174_v19  ;;  %1245 = vmatprep.subr.msk.bf16.mxu0 %vm203_vm1, %v397_v20  ;;  %v503_v32 = vsel %vm502_vm5, %v497_v23, %v499_v22 }
  0x9b   : > { %1306 = vmatpush3.bf16.msra.mxu1 %v408_v21  ;;  %1307 = vmatprep.mubr.msk.bf16.mxu1 %vm1470_vm0, %v1469_v0  ;;  %v509_v34 = vsel %vm203_vm1, %v503_v32, 0 }
  0x9c   : > { %1311 = vmatprep.subr.bf16.mxu1 %v1469_v0 }
  0x9d   : > { %v501_v26 = vpop.permute.xlu0 %500  ;;  %v604_v27 = vpop.permute.xlu1 %603 }
  0x9e   : > { %v504_v29 = vsel %vm502_vm5, %v499_v22, %v501_v26  ;;  %v515_v30 = vsel %vm203_vm1, %v501_v26, 0 }
  0xa0   : > { %1242 = vmatmul.mubr.msk.bf16.vlgmr.msra.gmra.mrb[4].mxu0 %vm199_vm2, %v174_v19 }
  0xa1   : > { %411 = vmatpush1.bf16.msra.mxu0 %v402_v25  ;;  %442 = vmatprep.mubr.bf16.mxu0 %v1471_v1  ;;  %v606_v31 = vpop.permute.xlu0 %605  ;;  %v608_v33 = vpop.permute.xlu1 %607 }
  0xa2   : > { %1308 = vmatmul.mubr.msk.bf16.vlgmr.msra.gmra.mrb[8].mxu1 %vm199_vm2, %v1244_v28  ;;  %1249 = vmatprep.subr.msk.bf16.mxu0 %vm203_vm1, %v504_v29  ;;  %v611_v37 = vsel %vm609_vm6, %v606_v31, %v608_v33  ;;  %v622_v38 = vsel %vm203_vm1, %v608_v33, 0  ;;  %v610_v40 = vsel %vm609_vm6, %v604_v27, %v606_v31 }
  0xa3   : > { %1312 = vmatpush3.bf16.msra.mxu1 %v515_v30  ;;  %1313 = vmatprep.mubr.msk.bf16.mxu1 %vm1470_vm0, %v1469_v0  ;;  %v616_v42 = vsel %vm203_vm1, %v610_v40, 0 }
  0xa4   : > { %1317 = vmatprep.subr.bf16.mxu1 %v1469_v0 }
  0xa5   : > { %v711_v35 = vpop.permute.xlu0 %710  ;;  %v713_v39 = vpop.permute.xlu1 %712 }
  0xa6   : > { %v717_v48 = vsel %vm716_vm7, %v711_v35, %v713_v39 }
  0xa7   : > { %v723_v50 = vsel %vm203_vm1, %v717_v48, 0 }
  0xa8   : > { %1246 = vmatmul.mubr.msk.bf16.vlgmr.msra.gmra.mrb[8].mxu0 %vm199_vm2, %v1244_v28 }
  0xa9   : > { %518 = vmatpush1.bf16.msra.mxu0 %v509_v34  ;;  %549 = vmatprep.mubr.bf16.mxu0 %v1471_v1  ;;  %v715_v41 = vpop.permute.xlu0 %714  ;;  %v818_v43 = vpop.permute.xlu1 %817 }
  0xaa   : > { %1314 = vmatmul.mubr.msk.bf16.vlgmr.msra.gmra.mrb[12].mxu1 %vm199_vm2, %v1248_v36  ;;  %1253 = vmatprep.subr.msk.bf16.mxu0 %vm203_vm1, %v611_v37  ;;  %v718_v45 = vsel %vm716_vm7, %v713_v39, %v715_v41  ;;  %v729_v46 = vsel %vm203_vm1, %v715_v41, 0 }
  0xab   : > { %1318 = vmatpush3.bf16.msra.mxu1 %v622_v38  ;;  %1319 = vmatprep.mubr.msk.bf16.mxu1 %vm1470_vm0, %v1469_v0 }
  0xac   : > { %1323 = vmatprep.subr.bf16.mxu1 %v1469_v0 }
  0xad   : > { %v820_v47 = vpop.permute.xlu0 %819  ;;  %v822_v49 = vpop.permute.xlu1 %821 }
  0xae   : > { %v825_v53 = vsel %vm823_vm8, %v820_v47, %v822_v49  ;;  %v836_v54 = vsel %vm203_vm1, %v822_v49, 0  ;;  %v824_v56 = vsel %vm823_vm8, %v818_v43, %v820_v47 }
  0xaf   : > { %v830_v58 = vsel %vm203_vm1, %v824_v56, 0 }
  0xb0   : > { %1250 = vmatmul.mubr.msk.bf16.vlgmr.msra.gmra.mrb[12].mxu0 %vm199_vm2, %v1248_v36 }
  0xb1   : > { %625 = vmatpush1.bf16.msra.mxu0 %v616_v42  ;;  %656 = vmatprep.mubr.bf16.mxu0 %v1471_v1  ;;  %v925_v51 = vpop.permute.xlu0 %924  ;;  %v927_v55 = vpop.permute.xlu1 %926 }
  0xb2   : > { %1320 = vmatmul.mubr.msk.bf16.vlgmr.msra.gmra.mrb[16].mxu1 %vm199_vm2, %v1252_v44  ;;  %1257 = vmatprep.subr.msk.bf16.mxu0 %vm203_vm1, %v718_v45  ;;  %v931_v63 = vsel %vm930_vm9, %v925_v51, %v927_v55 }
  0xb3   : > { %1324 = vmatpush3.bf16.msra.mxu1 %v729_v46  ;;  %1325 = vmatprep.mubr.msk.bf16.mxu1 %vm1470_vm0, %v1469_v0  ;;  %v937_v4 = vsel %vm203_vm1, %v931_v63, 0 }
  0xb4   : > { %1329 = vmatprep.subr.bf16.mxu1 %v1469_v0 }
  0xb5   : > { %v929_v57 = vpop.permute.xlu0 %928  ;;  %v1032_v59 = vpop.permute.xlu1 %1031 }
  0xb6   : > { %v932_v61 = vsel %vm930_vm9, %v927_v55, %v929_v57  ;;  %v943_v62 = vsel %vm203_vm1, %v929_v57, 0 }
  0xb8   : > { %1254 = vmatmul.mubr.msk.bf16.vlgmr.msra.gmra.mrb[16].mxu0 %vm199_vm2, %v1252_v44 }
  0xb9   : > { %732 = vmatpush1.bf16.msra.mxu0 %v723_v50  ;;  %763 = vmatprep.mubr.bf16.mxu0 %v1471_v1  ;;  %v1034_v2 = vpop.permute.xlu0 %1033  ;;  %v1036_v3 = vpop.permute.xlu1 %1035 }
  0xba   : > { %1326 = vmatmul.mubr.msk.bf16.vlgmr.msra.gmra.mrb[20].mxu1 %vm199_vm2, %v1256_v52  ;;  %1261 = vmatprep.subr.msk.bf16.mxu0 %vm203_vm1, %v825_v53  ;;  %v1039_v6 = vsel %vm1037_vm10, %v1034_v2, %v1036_v3  ;;  %v1050_v7 = vsel %vm203_vm1, %v1036_v3, 0  ;;  %v1038_v8 = vsel %vm1037_vm10, %v1032_v59, %v1034_v2 }
  0xbb   : > { %1330 = vmatpush3.bf16.msra.mxu1 %v836_v54  ;;  %1331 = vmatprep.mubr.msk.bf16.mxu1 %vm1470_vm0, %v1469_v0  ;;  %v1044_v9 = vsel %vm203_vm1, %v1038_v8, 0 }
  0xbc   : > { %1335 = vmatprep.subr.bf16.mxu1 %v1469_v0 }
  0xc0   : > { %1258 = vmatmul.mubr.msk.bf16.vlgmr.msra.gmra.mrb[20].mxu0 %vm199_vm2, %v1256_v52 }
  0xc1   : > { %839 = vmatpush1.bf16.msra.mxu0 %v830_v58  ;;  %870 = vmatprep.mubr.bf16.mxu0 %v1471_v1 }
  0xc2   : > { %1332 = vmatmul.mubr.msk.bf16.vlgmr.msra.gmra.mrb[24].mxu1 %vm199_vm2, %v1260_v60  ;;  %1265 = vmatprep.subr.msk.bf16.mxu0 %vm203_vm1, %v932_v61 }
  0xc3   : > { %1336 = vmatpush3.bf16.msra.mxu1 %v943_v62  ;;  %1337 = vmatprep.mubr.msk.bf16.mxu1 %vm1470_vm0, %v1469_v0 }
  0xc4   : > { %1341 = vmatprep.subr.bf16.mxu1 %v1469_v0 }
  0xc8   : > { %1262 = vmatmul.mubr.msk.bf16.vlgmr.msra.gmra.mrb[24].mxu0 %vm199_vm2, %v1260_v60 }
  0xc9   : > { %946 = vmatpush1.bf16.msra.mxu0 %v937_v4  ;;  %977 = vmatprep.mubr.bf16.mxu0 %v1471_v1 }
  0xca   : > { %1338 = vmatmul.mubr.msk.bf16.vlgmr.msra.gmra.mrb[28].mxu1 %vm199_vm2, %v1264_v5  ;;  %1269 = vmatprep.subr.msk.bf16.mxu0 %vm203_vm1, %v1039_v6 }
  0xcb   : > { %1342 = vmatpush3.bf16.msra.mxu1 %v1050_v7  ;;  %1343 = vmatprep.mubr.msk.bf16.mxu1 %vm1470_vm0, %v1469_v0 }
  0xd0   : > { %1266 = vmatmul.mubr.msk.bf16.vlgmr.msra.gmra.mrb[28].mxu0 %vm199_vm2, %v1264_v5 }
  0xd1   : > { %1053 = vmatpush1.bf16.msra.mxu0 %v1044_v9  ;;  %1084 = vmatprep.mubr.bf16.mxu0 %v1471_v1 }
  0xd2   : > { %1344 = vmatmul.mubr.msk.bf16.vlgmr.msra.gmra.mrb[32].mxu1 %vm199_vm2, %v1268_v10 }
  0xd8   : > { %1270 = vmatmul.mubr.msk.bf16.vlgmr.msra.gmra.mrb[32].mxu0 %vm199_vm2, %v1268_v10 }
 0x165   : > { %v288_v11 = vpop.f32.mrb[0].mxu1 }
 0x166   : > { %v1297_v12 = vpop.f32.mrb[1].mxu1 }
 0x167   : > { %v291_v13 = vpop.f32.mrb[2].mxu1 }
 0x168   : > { %v1298_v14 = vpop.f32.mrb[3].mxu1 }
 0x16b   : > { %v247_v0 = vpop.f32.mrb[0].mxu0 }
 0x16c   : > { %v249_v15 = vpop.f32.mrb[1].mxu0 }
 0x16d   : > { %v251_v16 = vpop.f32.mrb[2].mxu0  ;;  %v381_v17 = vpop.f32.mrb[4].mxu1 }
 0x16e   : > { %v252_v18 = vpop.f32.mrb[3].mxu0  ;;  %v382_v19 = vadd.f32 %v381_v17, %v288_v11  ;;  %v1303_v20 = vpop.f32.mrb[5].mxu1 }
 0x16f   : > { %v384_v21 = vpop.f32.mrb[6].mxu1 }
 0x170   : > { %v1304_v22 = vpop.f32.mrb[7].mxu1 }
 0x173   : > { %v340_v23 = vpop.f32.mrb[4].mxu0 }
 0x174   : > { %v341_v24 = vadd.f32 %v340_v23, %v247_v0  ;;  %v342_v1 = vpop.f32.mrb[5].mxu0 }
 0x175   : > { %v343_v25 = vadd.f32 %v342_v1, %v249_v15  ;;  %v344_v26 = vpop.f32.mrb[6].mxu0  ;;  %v485_v27 = vpop.f32.mrb[8].mxu1 }
 0x176   : > { %v345_v28 = vpop.f32.mrb[7].mxu0  ;;  %v493_v29 = vadd.f32 %v485_v27, %v382_v19  ;;  %v1309_v30 = vpop.f32.mrb[9].mxu1 }
 0x177   : > { %v488_v31 = vpop.f32.mrb[10].mxu1  ;;  %v1140_v27 = vpop.permute.xlu0 %1139 }
 0x178   : > { %v1310_v32 = vpop.f32.mrb[11].mxu1 }
 0x17b   : > { %v444_v33 = vpop.f32.mrb[8].mxu0 }
 0x17c   : > { %v491_v34 = vadd.f32 %v444_v33, %v341_v24  ;;  %v446_v35 = vpop.f32.mrb[9].mxu0 }
 0x17d   : > { %v492_v36 = vadd.f32 %v446_v35, %v343_v25  ;;  %v448_v37 = vpop.f32.mrb[10].mxu0  ;;  %v592_v38 = vpop.f32.mrb[12].mxu1 }
 0x17e   : > { %v449_v39 = vpop.f32.mrb[11].mxu0  ;;  %v600_v40 = vadd.f32 %v592_v38, %v493_v29  ;;  %v1315_v41 = vpop.f32.mrb[13].mxu1 }
 0x17f   : > { %v595_v42 = vpop.f32.mrb[14].mxu1 }
 0x180   : > { %v1316_v43 = vpop.f32.mrb[15].mxu1 }
 0x183   : > { %v551_v44 = vpop.f32.mrb[12].mxu0 }
 0x184   : > { %v598_v45 = vadd.f32 %v551_v44, %v491_v34  ;;  %v553_v46 = vpop.f32.mrb[13].mxu0 }
 0x185   : > { %v599_v47 = vadd.f32 %v553_v46, %v492_v36  ;;  %v555_v48 = vpop.f32.mrb[14].mxu0  ;;  %v699_v49 = vpop.f32.mrb[16].mxu1 }
 0x186   : > { %v556_v50 = vpop.f32.mrb[15].mxu0  ;;  %v707_v51 = vadd.f32 %v699_v49, %v600_v40  ;;  %v1321_v52 = vpop.f32.mrb[17].mxu1 }
 0x187   : > { %v702_v53 = vpop.f32.mrb[18].mxu1 }
 0x188   : > { %v1322_v54 = vpop.f32.mrb[19].mxu1 }
 0x18b   : > { %v658_v55 = vpop.f32.mrb[16].mxu0 }
 0x18c   : > { %v705_v56 = vadd.f32 %v658_v55, %v598_v45  ;;  %v660_v57 = vpop.f32.mrb[17].mxu0 }
 0x18d   : > { %v706_v58 = vadd.f32 %v660_v57, %v599_v47  ;;  %v662_v59 = vpop.f32.mrb[18].mxu0  ;;  %v806_v60 = vpop.f32.mrb[20].mxu1 }
 0x18e   : > { %v663_v61 = vpop.f32.mrb[19].mxu0  ;;  %v814_v62 = vadd.f32 %v806_v60, %v707_v51  ;;  %v1327_v63 = vpop.f32.mrb[21].mxu1 }
 0x18f   : > { %v809_v2 = vpop.f32.mrb[22].mxu1 }
 0x190   : > { %v1328_v3 = vpop.f32.mrb[23].mxu1 }
 0x193   : > { %v765_v4 = vpop.f32.mrb[20].mxu0 }
 0x194   : > { %v812_v5 = vadd.f32 %v765_v4, %v705_v56  ;;  %v767_v6 = vpop.f32.mrb[21].mxu0 }
 0x195   : > { %v813_v7 = vadd.f32 %v767_v6, %v706_v58  ;;  %v769_v8 = vpop.f32.mrb[22].mxu0  ;;  %v913_v9 = vpop.f32.mrb[24].mxu1 }
 0x196   : > { %v770_v10 = vpop.f32.mrb[23].mxu0  ;;  %v921_v11 = vadd.f32 %v913_v9, %v814_v62  ;;  %v1333_v12 = vpop.f32.mrb[25].mxu1 }
 0x197   : > { %v916_v13 = vpop.f32.mrb[26].mxu1 }
 0x198   : > { %v1334_v14 = vpop.f32.mrb[27].mxu1 }
 0x19b   : > { %v872_v0 = vpop.f32.mrb[24].mxu0 }
 0x19c   : > { %v919_v15 = vadd.f32 %v872_v0, %v812_v5  ;;  %v874_v16 = vpop.f32.mrb[25].mxu0 }
 0x19d   : > { %v920_v17 = vadd.f32 %v874_v16, %v813_v7  ;;  %v876_v18 = vpop.f32.mrb[26].mxu0  ;;  %v1020_v19 = vpop.f32.mrb[28].mxu1 }
 0x19e   : > { %v877_v20 = vpop.f32.mrb[27].mxu0  ;;  %v1028_v21 = vadd.f32 %v1020_v19, %v921_v11  ;;  %v1339_v22 = vpop.f32.mrb[29].mxu1 }
 0x19f   : > { %v1023_v23 = vpop.f32.mrb[30].mxu1 }
 0x1a0   : > { %v1340_v24 = vpop.f32.mrb[31].mxu1 }
 0x1a3   : > { %v979_v1 = vpop.f32.mrb[28].mxu0 }
 0x1a4   : > { %v1026_v25 = vadd.f32 %v979_v1, %v919_v15  ;;  %v981_v26 = vpop.f32.mrb[29].mxu0 }
 0x1a5   : > { %v1027_v28 = vadd.f32 %v981_v26, %v920_v17  ;;  %v983_v29 = vpop.f32.mrb[30].mxu0  ;;  %v1127_v30 = vpop.f32.mrb[32].mxu1 }
 0x1a6   : > { %v984_v31 = vpop.f32.mrb[31].mxu0  ;;  %v1135_v32 = vadd.f32 %v1127_v30, %v1028_v21  ;;  %v1345_v33 = vpop.f32.mrb[33].mxu1 }
 0x1a7   : > { %v1130_v34 = vpop.f32.mrb[34].mxu1 }
 0x1a8   : > { %v1144_v35 = vadd.f32 %v1140_v27, %v1135_v32  ;;  %v1346_v36 = vpop.f32.mrb[35].mxu1 }
 0x1aa   : > { %v1147_v37 = vmax.f32 %v1144_v35, 0.0 }
 0x1ab   : > { %v1086_v38 = vpop.f32.mrb[32].mxu0 }
 0x1ac   : > { %v1133_v39 = vadd.f32 %v1086_v38, %v1026_v25  ;;  %v1088_v40 = vpop.f32.mrb[33].mxu0  ;;  %1154 = vst.msk [vmem:[%s163_s20 + $0x8] sm:$0xf] %vm1153_vm11, %v1147_v37 }
 0x1ad   : > { %v1134_v41 = vadd.f32 %v1088_v40, %v1027_v28  ;;  %v1090_v42 = vpop.f32.mrb[34].mxu0 }
 0x1ae   : > { %v1142_v43 = vadd.f32 %v1140_v27, %v1133_v39  ;;  %v1091_v44 = vpop.f32.mrb[35].mxu0 }
 0x1af   : > { %v1143_v45 = vadd.f32 %v1140_v27, %v1134_v41 }
 0x1b0   : > { %v1145_v46 = vmax.f32 %v1142_v43, 0.0 }
 0x1b1   : > { %v1146_v47 = vmax.f32 %v1143_v45, 0.0 }
 0x1b3   : > { %v1150_v48 = vcombine.low %v1145_v46, %v1146_v47 }
 0x1b5   : > { %1152 = vst [vmem:[%s163_s20] sm:$0xff] %v1150_v48 }
 0x1b6   : > { %1418 = shalt.err (!%p1415_p3)
}
 0x1b7   : > { %s1419_s6 = scalar_lea.hbm %s1675_s28, 192  ;;  %s1423_s9 = scalar_lea.hbm %s1722_s3, 384 }
 0x1b8   : > { %p1420_p4 = scmp.ne.s32.totalorder %s1675_s28, %s1419_s6  ;;  %p1424_p9 = scmp.lt.u32.totalorder %s1675_s28, %s1722_s3 }
 0x1b9   : > { %p1425_p10 = scmp.lt.u32.totalorder %s1423_s9, %s1419_s6  ;;  %p1427_p12 = scmp.lt.u32.totalorder %s1419_s6, %s1675_s28 }
 0x1ba   : > { %p1421_p7 = pnand %p1420_p4, %p1539_p5 }
 0x1bb   : > { %p1426_p11 = por %p1425_p10, %p1424_p9 }
 0x1bc   : > { %p1422_p8 = pneg %p1421_p7 }
 0x1bd   : > { %p1428_p13 = por %p1427_p12, %p1426_p11 }
 0x1bf   : > { %p1429_p0 = pnand %p1428_p13, %p1422_p8 }
 0x1c1   : > { %1432 = shalt.err (!%p1429_p0)
}
 0x1c2   : > { %1350 = dma.vmem_to_hbm [thread:$0]  (%p1539_p5), %s1677_s25, 192, %s1675_s28, %s1156_s29  }
 0x1c3 PF: > { %p1356_p1 = scmp.ge.s32.totalorder %s1467_s15, 2  ;;  %s1182_s17 = sand.u32 1, %s1455_s12  }
 0x1c4   : > { %s1183_s19 = scalar_lea.sflag [#allocation3], %s1182_s17 }
 0x1c5   : > { %p1353_p2 = pnand %p1356_p1, %p1543_p6 }
 0x1c7   : > { %1450 = dma.done.wait (!%p1353_p2), %s1183_s19, 192  }
 0x1c8   : > { %1452 = vsyncadd (!%p1353_p2), %s1183_s19, 4294967104  ;;  %p13_p3 = scmp.ge.s32.totalorder %s1526_s18, 4   ;;  %s1725_s12 = smov %s1459_s13 }
 0x1c9   : > { %s1726_s13 = smov %s1463_s14  ;;  %s1727_s14 = smov %s1537_s21 }
 0x1ca   : > { %s1728_s15 = smov %s1526_s18  ;;  %15 = sbr.rel (!%p13_p3) target bundleno = 3 (0x3), region = 75 }
 0x1d1   :  { %1188 = vsyncpa [#allocation3], 1 }
 0x1d2   :  { %1190 = vsyncpa [#allocation3 + $0x1], 1 }

</bundles_post_ra>
